<compile_context>
chip_gen: v7x
topology: tpu7x:2x2x1
jax: 0.10.0
libtpu: 0.0.40
codegen_flags: <defaults>
</compile_context>

<pallas_src>
import functools

import jax
import jax.numpy as jnp
from jax.experimental import pallas as pl
from jax.experimental.pallas import tpu as pltpu


def _round_up(x, m):
    return ((x + m - 1) // m) * m


def _dropout_bits(key, shape):
    """uint32 random bits used for the dropout mask (shared by kernel + test)."""
    return jax.random.bits(key, shape, dtype=jnp.uint32)


def _embedding_kernel(ids_ref, pos_ref, wtab_ref, ptab_ref, *rest,
                      kv, kp, nk, tkv, tkp, drop_threshold, keep_scale):
    """Grid = (token_tiles, nk).  nk = max(kv, kp) reduction steps.

    ids_ref/pos_ref : (TB, 1) int32
    wtab_ref        : (TKV, H) vocab tile  (valid for k < kv)
    ptab_ref        : (TKP, H) pos tile    (valid for k < kp)
    bits_ref        : (TB, H) uint32  (only when dropout is active)
    out_ref         : (TB, H)
    acc_ref         : (TB, H) f32 scratch, persists across the k axis
    """
    if drop_threshold is not None:
        bits_ref, out_ref, acc_ref = rest
    else:
        bits_ref = None
        out_ref, acc_ref = rest

    k = pl.program_id(1)
    tb = out_ref.shape[0]

    @pl.when(k == 0)
    def _init():
        acc_ref[...] = jnp.zeros_like(acc_ref)

    ids = ids_ref[...]   # (TB, 1) int32
    pos = pos_ref[...]   # (TB, 1) int32

    def add_word():
        col = jax.lax.broadcasted_iota(jnp.int32, (tb, tkv), 1) + k * tkv
        onehot = (ids == col).astype(wtab_ref.dtype)            # (TB, TKV)
        acc_ref[...] += jnp.dot(onehot, wtab_ref[...],
                                preferred_element_type=jnp.float32)

    def add_pos():
        col = jax.lax.broadcasted_iota(jnp.int32, (tb, tkp), 1) + k * tkp
        onehot = (pos == col).astype(ptab_ref.dtype)            # (TB, TKP)
        acc_ref[...] += jnp.dot(onehot, ptab_ref[...],
                                preferred_element_type=jnp.float32)

    # Guard each table's contribution only when its reduction is shorter than nk.
    if kv == nk:
        add_word()
    else:
        pl.when(k < kv)(add_word)

    if kp == nk:
        add_pos()
    else:
        pl.when(k < kp)(add_pos)

    @pl.when(k == nk - 1)
    def _finalize():
        emb = acc_ref[...]
        if drop_threshold is not None:
            # torch.nn.Dropout training semantics: drop with prob p, scale 1/(1-p).
            # Threshold directly on the uint32 bits (P(bits < T) = T / 2^32 = p).
            keep = bits_ref[...] >= jnp.uint32(drop_threshold)
            emb = jnp.where(keep, emb * jnp.float32(keep_scale), jnp.float32(0.0))
        out_ref[...] = emb.astype(out_ref.dtype)


def embedding_forward(input_ids, position_ids, word_table, pos_table, *,
                      dropout_prob=0.1, training=False, dropout_rng=None,
                      tb=128, tkv=512, tkp=512):
    """Megatron Embedding.forward (num_tokentypes == 0, tokentype_ids is None)."""
    B, S = input_ids.shape
    V, H = word_table.shape
    P, H2 = pos_table.shape
    assert H2 == H
    N = B * S

    # ---- token tiling (pad N up; padded rows gather row 0 and are sliced off) ----
    n_pad = _round_up(N, tb)
    ids_flat = jnp.pad(input_ids.reshape(-1).astype(jnp.int32),
                       (0, n_pad - N)).reshape(n_pad, 1)
    pos_flat = jnp.pad(position_ids.reshape(-1).astype(jnp.int32),
                       (0, n_pad - N)).reshape(n_pad, 1)
    token_tiles = n_pad // tb

    # ---- vocab / position tiling along a shared reduction axis ----
    tkv_eff = _round_up(min(tkv, V), 8)
    tkp_eff = _round_up(min(tkp, P), 8)
    v_pad = _round_up(V, tkv_eff)
    p_pad = _round_up(P, tkp_eff)
    wtab_p = jnp.pad(word_table, ((0, v_pad - V), (0, 0))) if v_pad != V else word_table
    ptab_p = jnp.pad(pos_table, ((0, p_pad - P), (0, 0))) if p_pad != P else pos_table
    kv = v_pad // tkv_eff
    kp = p_pad // tkp_eff
    nk = max(kv, kp)

    # Clamp the block index once a table's reduction is exhausted -> no re-DMA.
    w_map = (lambda t, k: (k, 0)) if kv == nk else \
            (lambda t, k: (jnp.minimum(k, kv - 1), 0))
    p_map = (lambda t, k: (k, 0)) if kp == nk else \
            (lambda t, k: (jnp.minimum(k, kp - 1), 0))

    in_specs = [
        pl.BlockSpec((tb, 1), lambda t, k: (t, 0)),        # input_ids
        pl.BlockSpec((tb, 1), lambda t, k: (t, 0)),        # position_ids
        pl.BlockSpec((tkv_eff, H), w_map),                 # word table tile
        pl.BlockSpec((tkp_eff, H), p_map),                 # pos table tile
    ]
    inputs = [ids_flat, pos_flat, wtab_p, ptab_p]

    use_dropout = bool(training) and float(dropout_prob) > 0.0
    if use_dropout:
        if dropout_rng is None:
            dropout_rng = jax.random.PRNGKey(0)
        bits = _dropout_bits(dropout_rng, (n_pad, H))
        in_specs.append(pl.BlockSpec((tb, H), lambda t, k: (t, 0)))
        inputs.append(bits)
        drop_threshold = min(int(round(float(dropout_prob) * (2 ** 32))), 2 ** 32 - 1)
        keep_scale = 1.0 / (1.0 - float(dropout_prob))
    else:
        drop_threshold = None
        keep_scale = 1.0

    out_dtype = word_table.dtype
    out_itemsize = jnp.dtype(out_dtype).itemsize

    # Scoped-VMEM budget: double-buffered tiles + f32 accumulator + headroom.
    vmem_bytes = (2 * tkv_eff * H * jnp.dtype(word_table.dtype).itemsize
                  + 2 * tkp_eff * H * jnp.dtype(pos_table.dtype).itemsize
                  + 2 * tb * H * out_itemsize
                  + tb * H * 4
                  + 4 * tb * 4)
    if use_dropout:
        vmem_bytes += 2 * tb * H * 4
    vmem_limit = int(min(max(2 * vmem_bytes, 32 * (2 ** 20)), 100 * (2 ** 20)))

    kernel = functools.partial(
        _embedding_kernel,
        kv=kv, kp=kp, nk=nk, tkv=tkv_eff, tkp=tkp_eff,
        drop_threshold=drop_threshold, keep_scale=keep_scale,
    )

    out_flat = pl.pallas_call(
        kernel,
        out_shape=jax.ShapeDtypeStruct((n_pad, H), out_dtype),
        grid_spec=pltpu.PrefetchScalarGridSpec(
            num_scalar_prefetch=0,
            grid=(token_tiles, nk),                 # reduction axis last
            in_specs=in_specs,
            out_specs=pl.BlockSpec((tb, H), lambda t, k: (t, 0)),
            scratch_shapes=[pltpu.VMEM((tb, H), jnp.float32)],
        ),
        compiler_params=pltpu.CompilerParams(
            dimension_semantics=("parallel", "arbitrary"),
            vmem_limit_bytes=vmem_limit,
        ),
    )(*inputs)

    return out_flat[:N].reshape(B, S, H)


if __name__ == "__main__":
    # Small, module-consistent shapes.
    B, S = 2, 8            # batch, sequence
    H = 128                # hidden_size
    V = 512                # vocab_size
    P = 64                 # max_sequence_length
    sigma = 0.02           # init_method_normal(sigma)
    dropout_prob = 0.1
    TB, TKV, TKP = 128, 256, 64   # TKV < V -> exercises the vocab reduction axis

    key = jax.random.PRNGKey(0)
    k_w, k_p, k_ids = jax.random.split(key, 3)

    # init_method_normal(sigma): N(0, sigma) for both embedding tables.
    word_table = (sigma * jax.random.normal(k_w, (V, H))).astype(jnp.float32)
    pos_table = (sigma * jax.random.normal(k_p, (P, H))).astype(jnp.float32)

    input_ids = jax.random.randint(k_ids, (B, S), 0, V, dtype=jnp.int32)
    position_ids = jnp.tile(jnp.arange(S, dtype=jnp.int32)[None, :], (B, 1))

    ref = (jnp.take(word_table, input_ids, axis=0)
           + jnp.take(pos_table, position_ids, axis=0))

    # --- eval mode: dropout is identity -> exact reference check ---
    out = embedding_forward(input_ids, position_ids, word_table, pos_table,
                            dropout_prob=dropout_prob, training=False,
                            tb=TB, tkv=TKV, tkp=TKP)
    out = jax.block_until_ready(out)
    assert out.shape == (B, S, H)
    assert jnp.allclose(out, ref, atol=1e-5, rtol=1e-5), "eval mismatch vs reference"

    # --- training mode: dropout mask is reproducible from the JAX key ---
    drop_key = jax.random.PRNGKey(123)
    out_train = embedding_forward(input_ids, position_ids, word_table, pos_table,
                                  dropout_prob=dropout_prob, training=True,
                                  dropout_rng=drop_key, tb=TB, tkv=TKV, tkp=TKP)
    out_train = jax.block_until_ready(out_train)
    assert out_train.shape == (B, S, H)

    n_pad = _round_up(B * S, TB)
    threshold = min(int(round(dropout_prob * (2 ** 32))), 2 ** 32 - 1)
    bits = _dropout_bits(drop_key, (n_pad, H))[:B * S].reshape(B, S, H)
    keep = bits >= jnp.uint32(threshold)
    ref_train = jnp.where(keep, ref / (1.0 - dropout_prob), 0.0)
    assert jnp.allclose(out_train, ref_train, atol=1e-5, rtol=1e-5), \
        "training-mode dropout mismatch vs reference"

    print("KERNEL_OK")
</pallas_src>

<mosaic_0001>
module attributes {stable_mosaic.version = 11 : i64} {
  func.func @_embedding_kernel(%arg0: i32, %arg1: i32, %arg2: memref<128x1xi32, #tpu.memory_space<vmem>>, %arg3: memref<128x1xi32, #tpu.memory_space<vmem>>, %arg4: memref<256x128xf32, #tpu.memory_space<vmem>>, %arg5: memref<64x128xf32, #tpu.memory_space<vmem>>, %arg6: memref<128x128xf32, #tpu.memory_space<vmem>>, %arg7: memref<128x128xf32, #tpu.memory_space<vmem>>) attributes {dimension_semantics = [#tpu.dimension_semantics<parallel>, #tpu.dimension_semantics<arbitrary>], iteration_bounds = array<i64: 1, 2>, scalar_prefetch = 0 : i64, scratch_operands = 1 : i64, tpu.core_type = #tpu.core_type<tc>, window_params = [{transform_indices = @transform_0, window_bounds = array<i64: 128, 1>}, {transform_indices = @transform_1, window_bounds = array<i64: 128, 1>}, {transform_indices = @transform_2, window_bounds = array<i64: 256, 128>}, {transform_indices = @transform_3, window_bounds = array<i64: 64, 128>}, {transform_indices = @transform_4, window_bounds = array<i64: 128, 128>}]} {
    %c0_i32 = arith.constant 0 : i32
    %0 = arith.cmpi eq, %arg1, %c0_i32 : i32
    %1 = arith.extui %0 : i1 to i32
    %c0_i32_0 = arith.constant 0 : i32
    %2 = arith.cmpi ne, %1, %c0_i32_0 : i32
    scf.if %2 {
      %cst_13 = arith.constant 0.000000e+00 : f32
      %24 = vector.broadcast %cst_13 : f32 to vector<128x128xf32>
      %c0_14 = arith.constant 0 : index
      %c0_15 = arith.constant 0 : index
      %25 = vector.load %arg7[%c0_14, %c0_15] : memref<128x128xf32, #tpu.memory_space<vmem>>, vector<128x128xf32>
      tpu.vector_store %arg7[%c0_14, %c0_15], %24 {strides = array<i32>} : memref<128x128xf32, #tpu.memory_space<vmem>>, vector<128x128xf32>,
    } else {
    }
    %c0 = arith.constant 0 : index
    %c0_1 = arith.constant 0 : index
    %3 = vector.load %arg2[%c0, %c0_1] : memref<128x1xi32, #tpu.memory_space<vmem>>, vector<128x1xi32>
    %c0_2 = arith.constant 0 : index
    %c0_3 = arith.constant 0 : index
    %4 = vector.load %arg3[%c0_2, %c0_3] : memref<128x1xi32, #tpu.memory_space<vmem>>, vector<128x1xi32>
    %5 = tpu.iota {dimensions = array<i32: 1>} : vector<128x256xi32>
    %c256_i32 = arith.constant 256 : i32
    %6 = arith.muli %arg1, %c256_i32 : i32
    %7 = vector.broadcast %6 : i32 to vector<128x256xi32>
    %8 = arith.addi %5, %7 : vector<128x256xi32>
    %9 = vector.broadcast %3 : vector<128x1xi32> to vector<128x256xi32>
    %10 = arith.cmpi eq, %9, %8 : vector<128x256xi32>
    %11 = arith.extui %10 : vector<128x256xi1> to vector<128x256xi32>
    %12 = arith.sitofp %11 : vector<128x256xi32> to vector<128x256xf32>
    %c0_4 = arith.constant 0 : index
    %c0_5 = arith.constant 0 : index
    %13 = vector.load %arg7[%c0_4, %c0_5] : memref<128x128xf32, #tpu.memory_space<vmem>>, vector<128x128xf32>
    %c0_6 = arith.constant 0 : index
    %c0_7 = arith.constant 0 : index
    %14 = vector.load %arg4[%c0_6, %c0_7] : memref<256x128xf32, #tpu.memory_space<vmem>>, vector<256x128xf32>
    %cst = arith.constant dense<0.000000e+00> : vector<128x128xf32>
    %15 = tpu.matmul %12, %14, %cst {dimension_numbers = #tpu.dot_dimension_numbers<[1], [0], [0], [1], [0, 0, 1, 1], [], []>} : vector<128x256xf32>, vector<256x128xf32>, vector<128x128xf32> -> vector<128x128xf32>
    %16 = arith.addf %13, %15 : vector<128x128xf32>
    %c0_8 = arith.constant 0 : index
    %c0_9 = arith.constant 0 : index
    %17 = vector.load %arg7[%c0_8, %c0_9] : memref<128x128xf32, #tpu.memory_space<vmem>>, vector<128x128xf32>
    tpu.vector_store %arg7[%c0_8, %c0_9], %16 {strides = array<i32>} : memref<128x128xf32, #tpu.memory_space<vmem>>, vector<128x128xf32>,
    %c1_i32 = arith.constant 1 : i32
    %18 = arith.cmpi slt, %arg1, %c1_i32 : i32
    %19 = arith.extui %18 : i1 to i32
    %c0_i32_10 = arith.constant 0 : i32
    %20 = arith.cmpi ne, %19, %c0_i32_10 : i32
    scf.if %20 {
      %24 = tpu.iota {dimensions = array<i32: 1>} : vector<128x64xi32>
      %c64_i32 = arith.constant 64 : i32
      %25 = arith.muli %arg1, %c64_i32 : i32
      %26 = vector.broadcast %25 : i32 to vector<128x64xi32>
      %27 = arith.addi %24, %26 : vector<128x64xi32>
      %28 = vector.broadcast %4 : vector<128x1xi32> to vector<128x64xi32>
      %29 = arith.cmpi eq, %28, %27 : vector<128x64xi32>
      %30 = arith.extui %29 : vector<128x64xi1> to vector<128x64xi32>
      %31 = arith.sitofp %30 : vector<128x64xi32> to vector<128x64xf32>
      %c0_13 = arith.constant 0 : index
      %c0_14 = arith.constant 0 : index
      %32 = vector.load %arg7[%c0_13, %c0_14] : memref<128x128xf32, #tpu.memory_space<vmem>>, vector<128x128xf32>
      %c0_15 = arith.constant 0 : index
      %c0_16 = arith.constant 0 : index
      %33 = vector.load %arg5[%c0_15, %c0_16] : memref<64x128xf32, #tpu.memory_space<vmem>>, vector<64x128xf32>
      %cst_17 = arith.constant dense<0.000000e+00> : vector<128x128xf32>
      %34 = tpu.matmul %31, %33, %cst_17 {dimension_numbers = #tpu.dot_dimension_numbers<[1], [0], [0], [1], [0, 0, 1, 1], [], []>} : vector<128x64xf32>, vector<64x128xf32>, vector<128x128xf32> -> vector<128x128xf32>
      %35 = arith.addf %32, %34 : vector<128x128xf32>
      %c0_18 = arith.constant 0 : index
      %c0_19 = arith.constant 0 : index
      %36 = vector.load %arg7[%c0_18, %c0_19] : memref<128x128xf32, #tpu.memory_space<vmem>>, vector<128x128xf32>
      tpu.vector_store %arg7[%c0_18, %c0_19], %35 {strides = array<i32>} : memref<128x128xf32, #tpu.memory_space<vmem>>, vector<128x128xf32>,
    } else {
    }
    %c1_i32_11 = arith.constant 1 : i32
    %21 = arith.cmpi eq, %arg1, %c1_i32_11 : i32
    %22 = arith.extui %21 : i1 to i32
    %c0_i32_12 = arith.constant 0 : i32
    %23 = arith.cmpi ne, %22, %c0_i32_12 : i32
    scf.if %23 {
      %c0_13 = arith.constant 0 : index
      %c0_14 = arith.constant 0 : index
      %24 = vector.load %arg7[%c0_13, %c0_14] : memref<128x128xf32, #tpu.memory_space<vmem>>, vector<128x128xf32>
      %c0_15 = arith.constant 0 : index
      %c0_16 = arith.constant 0 : index
      %25 = vector.load %arg6[%c0_15, %c0_16] : memref<128x128xf32, #tpu.memory_space<vmem>>, vector<128x128xf32>
      tpu.vector_store %arg6[%c0_15, %c0_16], %24 {strides = array<i32>} : memref<128x128xf32, #tpu.memory_space<vmem>>, vector<128x128xf32>,
    } else {
    }
    return
  }
  func.func @transform_0(%arg0: i32, %arg1: i32) -> (i32, i32) {
    %c0_i32 = arith.constant 0 : i32
    %c0_i32_0 = arith.constant 0 : i32
    return %arg0, %c0_i32 : i32, i32
  }
  func.func @transform_1(%arg0: i32, %arg1: i32) -> (i32, i32) {
    %c0_i32 = arith.constant 0 : i32
    %c0_i32_0 = arith.constant 0 : i32
    return %arg0, %c0_i32 : i32, i32
  }
  func.func @transform_2(%arg0: i32, %arg1: i32) -> (i32, i32) {
    %c0_i32 = arith.constant 0 : i32
    %c0_i32_0 = arith.constant 0 : i32
    return %arg1, %c0_i32 : i32, i32
  }
  func.func @transform_3(%arg0: i32, %arg1: i32) -> (i32, i32) {
    %c0_i32 = arith.constant 0 : i32
    %0 = arith.minsi %arg1, %c0_i32 : i32
    %c0_i32_0 = arith.constant 0 : i32
    %c0_i32_1 = arith.constant 0 : i32
    return %0, %c0_i32_0 : i32, i32
  }
  func.func @transform_4(%arg0: i32, %arg1: i32) -> (i32, i32) {
    %c0_i32 = arith.constant 0 : i32
    %c0_i32_0 = arith.constant 0 : i32
    return %arg0, %c0_i32 : i32, i32
  }
}

</mosaic_0001>

<bundles_post_ra>
// kernel: tpu_custom_call.1
= control target key start
LH: loop header
LB: loop body
LE: loop exit
PB: predicated region body
PF: predicated region fallthrough
CT: control target
= control target key end

     0   :  { %9 = vsyncpa [#allocation4], 0  ;;  %s2246_s0 = inlined_call_operand.vmem [shape: s32[128,1], index: 0, kind: input, shape index: {}]   ;;  %s2247_s1 = inlined_call_operand.vmem [shape: s32[128,1], index: 1, kind: input, shape index: {}]   ;;  %s2248_s2 = inlined_call_operand.hbm [shape: f32[512,128], index: 2, kind: input, shape index: {}]   ;;  %s2249_s3 = inlined_call_operand.vmem [shape: f32[64,128], index: 3, kind: input, shape index: {}]   ;;  %s2250_s4 = inlined_call_operand.hbm [shape: f32[128,128], index: 4, kind: output, shape index: {}]  }
   0x1   :  { %11 = vsyncpa [#allocation4 + $0x1], 0 }
   0x2   :  { %12 = vsyncpa [#allocation5], 0  ;;  %s1792_s15 = smov 0   ;;  %s1794_s16 = smov 0  }
   0x3   :  { %s1796_s17 = smov 0   ;;  %s1798_s18 = smov 0  }
   0x4   :  { %s1800_s19 = smov 0   ;;  %s1802_s20 = smov 0  }
   0x5 LB: > { %s1235_s21 = sadd.s32 4294967295, %s1754_s20   ;;  %s27_s22 = sadd.s32 1, %s1750_s19  ;;  %s1754_s20 = sphi %s1802_s20, %s18_s20   ;;  %s1750_s19 = sphi %s1800_s19, %s2259_s19   ;;  %s1746_s18 = sphi %s1798_s18, %s2258_s18   ;;  %s1742_s17 = sphi %s1796_s17, %s2257_s17   ;;  %s1738_s16 = sphi %s1794_s16, %s2256_s16   ;;  %s1734_s15 = sphi %s1792_s15, %s2255_s15  }
   0x6   : > { %p28_p0 = scmp.ge.s32.totalorder %s27_s22, 2  ;;  %s89_s23 = sadd.s32 1, %s1742_s17 }
   0x7   : > { %p96_p1 = scmp.ne.s32.totalorder %s1742_s17, %s1738_s16  ;;  %p97_p2 = scmp.eq.s32.totalorder %s1754_s20, 0 }
   0x8   : > { %s2261_s22 = smov (%p28_p0, %s27_s22), 0  ;;  %p102_p4 = scmp.ne.s32.totalorder %s1738_s16, %s1734_s15 }
   0x9   : > { %p1828_p3 = por %p97_p2, %p96_p1  ;;  %s86_s25 = ssub.s32 %s1750_s19, %s2261_s22 }
   0xa   : > { %p103_p5 = scmp.eq.s32.totalorder %s1235_s21, 0  ;;  %p87_p6 = scmp.eq.s32.totalorder %s86_s25, 0 }
   0xb   : > { %p1579_p8 = scmp.lt.s32.totalorder %s1754_s20, 2  ;;  %s200_s28 = sand.u32 1, %s1742_s17  }
   0xc   : > { %p1837_p7 = por %p103_p5, %p102_p4  ;;  %s1352_s29 = sshll.u32 %s1750_s19, 12 }
   0xd   : > { %s1843_s27 = scalar_select %p87_p6, %s1742_s17, %s89_s23  }
   0xe   : > { %s1240_s30 = sshll.u32 %s200_s28, 8  ;;  %s1850_s7 = scalar_lea.hbm %s2248_s2, %s1352_s29 }
   0xf   : > { %s204_s8 = scalar_lea.vmem [#allocation3], %s1240_s30  ;;  %p1854_p9 = pnand %p1579_p8, %p1828_p3 }
  0x10   : > { %s211_s9 = sshll.u32 %s204_s8, 4  ;;  %s1860_s11 = scalar_lea.sflag [#allocation4], %s200_s28  ;;  %s1858_s9 = int_to_ptr.vmem [resolvable:$true] %s211_s9 }
  0x11   : > { %s1644_s12 = scalar_lea.hbm %s1850_s7, 4096  ;;  %p1646_p11 = pneg %p1854_p9 }
  0x12   : > { %p1645_p10 = scmp.ne.s32.totalorder %s1850_s7, %s1644_s12  ;;  %s1649_s15 = scalar_lea.hbm %s2248_s2, 8192 }
  0x13   : > { %p1650_p0 = scmp.lt.u32.totalorder %s1850_s7, %s2248_s2  ;;  %p1651_p1 = scmp.lt.u32.totalorder %s1649_s15, %s1644_s12 }
  0x14   : > { %p1647_p12 = pnand %p1646_p11, %p1645_p10  ;;  %p1653_p3 = scmp.lt.u32.totalorder %s1644_s12, %s1850_s7 }
  0x15   : > { %p1652_p2 = por %p1651_p1, %p1650_p0 }
  0x16   : > { %p1648_p13 = pneg %p1647_p12 }
  0x17   : > { %p1654_p4 = por %p1653_p3, %p1652_p2 }
  0x19   : > { %p1655_p5 = pnand %p1654_p4, %p1648_p13 }
  0x1b   : > { %1658 = shalt.err (!%p1655_p5)
}
  0x1c   : > { %s1659_s25 = scalar_lea.vmem %s1858_s9, 4096  ;;  %s1756_s28 = smov [#allocation3]  }
  0x1d   : > { %p1660_p6 = scmp.ne.s32.totalorder %s1858_s9, %s1659_s25  ;;  %s1664_s29 = sshll.u32 %s1756_s28, 4  ;;  %s1665_s29 = int_to_ptr.vmem [resolvable:$false] %s1664_s29 }
  0x1e   : > { %s1666_s30 = scalar_lea.vmem %s1665_s29, 8192  ;;  %p1667_p12 = scmp.lt.s32.totalorder %s1858_s9, %s1665_s29 }
  0x1f   : > { %p1662_p8 = pnand %p1660_p6, %p1646_p11  ;;  %p1668_p0 = scmp.lt.s32.totalorder %s1666_s30, %s1659_s25 }
  0x21   : > { %p1663_p10 = pneg %p1662_p8  ;;  %p1669_p1 = por %p1668_p0, %p1667_p12 }
  0x23   : > { %p1670_p2 = pnand %p1669_p1, %p1663_p10 }
  0x25   : > { %1673 = shalt.err (!%p1670_p2)
}
  0x26   : > { %s1757_s5 = smov 128   ;;  %s1758_s6 = smov 8  }
  0x27   : > { %1578 = dma.hbm_to_vmem [thread:$0]  (!%p1854_p9), %s1850_s7, 4096, %s1858_s9, %s1860_s11, %s1757_s5, %s1757_s5, %s1758_s6  }
  0x28   : > { %p1243_p11 = scmp.ge.s32.totalorder %s1754_s20, 1  ;;  %p232_p13 = scmp.lt.s32.totalorder %s1754_s20, 3 }
  0x2a   : > { %p233_p3 = pnand %p1243_p11, %p232_p13 }
  0x2b   : > { %s238_s8 = sand.u32 (!%p233_p3), 1, %s1738_s16  }
  0x2c   : > { %236 = sbr.rel (%p233_p3) target bundleno = 837 (0x345), region = 36  ;;  %s1244_s12 = sshll.u32 (!%p233_p3), %s238_s8, 8 }
  0x2d   : > { %s239_s13 = scalar_lea.sflag (!%p233_p3), [#allocation4], %s238_s8  ;;  %s1891_s14 = scalar_lea.vmem (!%p233_p3), [#allocation3], %s1244_s12 }
  0x33   : > { %1725 = dma.done.wait (%p1837_p7), %s239_s13, 4096  }
  0x34   : > { %1727 = vsyncadd (%p1837_p7), %s239_s13, 4294963200  ;;  %p292_p4 = scmp.lt.s32.totalorder %s1746_s18, 0  ;;  %p1247_p5 = scmp.ne.s32.totalorder %s1746_s18, 0 }
  0x35   : > { %v1759_v0 = vmov (!%p1247_p5), 0.0  }
  0x36   : > { %s293_s7 = scalar_select %p292_p4, %s1746_s18, 0 }
  0x37   : > { %306 = sbr.rel (%p1247_p5) target bundleno = 63 (0x3f), region = 44  ;;  %307 = vst [vmem:[#allocation2] sm:$0xff] (!%p1247_p5), %v1759_v0  ;;  %308 = vst [vmem:[#allocation2 + $0x8] sm:$0xff] (!%p1247_p5), %v1759_v0 }
  0x38   : > { %s1245_s9 = sshll.u32 %s293_s7, 3  ;;  %309 = vst [vmem:[#allocation2 + $0x10] sm:$0xff] (!%p1247_p5), %v1759_v0  ;;  %310 = vst [vmem:[#allocation2 + $0x18] sm:$0xff] (!%p1247_p5), %v1759_v0 }
  0x39   : > { %p295_p9 = scmp.lt.s32.totalorder %s1245_s9, 7  ;;  %311 = vst [vmem:[#allocation2 + $0x20] sm:$0xff] (!%p1247_p5), %v1759_v0  ;;  %312 = vst [vmem:[#allocation2 + $0x28] sm:$0xff] (!%p1247_p5), %v1759_v0 }
  0x3a   : > { %313 = vst [vmem:[#allocation2 + $0x30] sm:$0xff] (!%p1247_p5), %v1759_v0  ;;  %314 = vst [vmem:[#allocation2 + $0x38] sm:$0xff] (!%p1247_p5), %v1759_v0 }
  0x3b   : > { %s2263_s9 = smov (!%p295_p9, %s1245_s9), 7  ;;  %315 = vst [vmem:[#allocation2 + $0x40] sm:$0xff] (!%p1247_p5), %v1759_v0  ;;  %316 = vst [vmem:[#allocation2 + $0x48] sm:$0xff] (!%p1247_p5), %v1759_v0 }
  0x3c   : > { %s1246_s10 = sshll.u32 %s2263_s9, 3  ;;  %317 = vst [vmem:[#allocation2 + $0x50] sm:$0xff] (!%p1247_p5), %v1759_v0  ;;  %318 = vst [vmem:[#allocation2 + $0x58] sm:$0xff] (!%p1247_p5), %v1759_v0 }
  0x3d   : > { %s1902_s23 = scalar_lea.vmem %s2249_s3, %s1246_s10  ;;  %319 = vst [vmem:[#allocation2 + $0x60] sm:$0xff] (!%p1247_p5), %v1759_v0  ;;  %320 = vst [vmem:[#allocation2 + $0x68] sm:$0xff] (!%p1247_p5), %v1759_v0 }
  0x3e   : > { %321 = vst [vmem:[#allocation2 + $0x70] sm:$0xff] %v1759_v0  ;;  %322 = vst [vmem:[#allocation2 + $0x78] sm:$0xff] %v1759_v0 }
  0x3f PF: > { %v324_v1 = vld [vmem:[%s2246_s0 + $0x8] sm:$0xff]  ;;  %v323_v2 = vld [vmem:[%s2246_s0] sm:$0xff]  ;;  %v1760_v3 = vmov 0   ;;  %v333_v6 = vld [vmem:[%s2246_s0 + $0x50] sm:$0xff]  ;;  %s1248_s26 = sshll.u32 %s1746_s18, 8  ;;  %p1313_p7 = scmp.ge.s32.totalorder %s1746_s18, 1 }
  0x40   : > { %1641 = vset.pattern.permute.xlu1 %v1760_v3  ;;  %1640 = vset.pattern.permute.xlu0 %v1760_v3  ;;  %v332_v4 = vld [vmem:[%s2246_s0 + $0x48] sm:$0xff]  ;;  %v331_v5 = vld [vmem:[%s2246_s0 + $0x40] sm:$0xff]  ;;  %v325_v7 = vld [vmem:[%s2246_s0 + $0x10] sm:$0xff] }
  0x41   : > { %366 = vperm.xlu1 %1641, %v324_v1   ;;  %363 = vperm.xlu0 %1640, %v323_v2   ;;  %v1926_v8 = vld [vmem:[%s2247_s1] sm:$0xff]  ;;  %v1931_v9 = vld [vmem:[%s2247_s1 + $0x8] sm:$0xff]  ;;  %v1936_v10 = vld [vmem:[%s2247_s1 + $0x10] sm:$0xff] }
  0x42   : > { %v1941_v11 = vld [vmem:[%s2247_s1 + $0x18] sm:$0xff]  ;;  %v1946_v12 = vld [vmem:[%s2247_s1 + $0x20] sm:$0xff]  ;;  %v1951_v13 = vld [vmem:[%s2247_s1 + $0x28] sm:$0xff] }
  0x43   : > { %v1956_v14 = vld [vmem:[%s2247_s1 + $0x30] sm:$0xff]  ;;  %v1961_v15 = vld [vmem:[%s2247_s1 + $0x38] sm:$0xff]  ;;  %v1966_v16 = vld [vmem:[%s2247_s1 + $0x40] sm:$0xff] }
  0x44   : > { %v1971_v17 = vld [vmem:[%s2247_s1 + $0x48] sm:$0xff]  ;;  %v1976_v18 = vld [vmem:[%s2247_s1 + $0x50] sm:$0xff]  ;;  %v334_v19 = vld [vmem:[%s2246_s0 + $0x58] sm:$0xff] }
  0x45   : > { %390 = vperm.xlu1 %1641, %v332_v4   ;;  %387 = vperm.xlu0 %1640, %v331_v5   ;;  %v326_v20 = vld [vmem:[%s2246_s0 + $0x18] sm:$0xff]  ;;  %v1992_v22 = vld [vmem:[%s2247_s1 + $0x60] sm:$0xff]  ;;  %v1997_v23 = vld [vmem:[%s2247_s1 + $0x68] sm:$0xff] }
  0x46   : > { %v1987_v21 = vld [vmem:[%s2247_s1 + $0x58] sm:$0xff]  ;;  %v2002_v24 = vld [vmem:[%s2247_s1 + $0x70] sm:$0xff]  ;;  %v538_v26 = vld [vmem:[%s1891_s14 + $0x80] sm:$0xff] }
  0x47   : > { %v2007_v25 = vld [vmem:[%s2247_s1 + $0x78] sm:$0xff]  ;;  %v539_v27 = vld [vmem:[%s1891_s14 + $0x88] sm:$0xff]  ;;  %v522_v28 = vld [vmem:[%s1891_s14] sm:$0xff] }
  0x48   : > { %v523_v29 = vld [vmem:[%s1891_s14 + $0x8] sm:$0xff]  ;;  %v1497_v30 = vpack.c.bf16 %v539_v27, %v538_v26  ;;  %v540_v32 = vld [vmem:[%s1891_s14 + $0x90] sm:$0xff]  ;;  %v541_v33 = vld [vmem:[%s1891_s14 + $0x98] sm:$0xff] }
  0x49   : > { %393 = vperm.xlu1 %1641, %v333_v6   ;;  %369 = vperm.xlu0 %1640, %v325_v7   ;;  %v1499_v31 = vpack.c.bf16 %v523_v29, %v522_v28  ;;  %v1501_v34 = vpack.c.bf16 %v541_v33, %v540_v32  ;;  %v524_v35 = vld [vmem:[%s1891_s14 + $0x10] sm:$0xff]  ;;  %v525_v36 = vld [vmem:[%s1891_s14 + $0x18] sm:$0xff]  ;;  %v542_v37 = vld [vmem:[%s1891_s14 + $0xa0] sm:$0xff] }
  0x4a   : > { %v543_v38 = vld [vmem:[%s1891_s14 + $0xa8] sm:$0xff]  ;;  %v335_v39 = vld [vmem:[%s2246_s0 + $0x60] sm:$0xff]  ;;  %1498 = vmatprep.subr.bf16.mxu0 %v1497_v30  ;;  %1545 = vmatprep.subr.bf16.mxu1 %v1497_v30  ;;  %v1503_v41 = vpack.c.bf16 %v525_v36, %v524_v35  ;;  %v544_v45 = vld [vmem:[%s1891_s14 + $0xb0] sm:$0xff] }
  0x4b   : > { %v327_v40 = vld [vmem:[%s2246_s0 + $0x20] sm:$0xff]  ;;  %1500 = vmatpush3.bf16.msra.mxu0 %v1499_v31  ;;  %1553 = vmatpush3.bf16.msra.mxu1 %v1499_v31  ;;  %v1505_v42 = vpack.c.bf16 %v543_v38, %v542_v37  ;;  %v527_v44 = vld [vmem:[%s1891_s14 + $0x28] sm:$0xff]  ;;  %v545_v46 = vld [vmem:[%s1891_s14 + $0xb8] sm:$0xff]  ;;  %v359_v37 = vstv %s1248_s26 }
  0x4c   : > { %1502 = vmatprep.subr.bf16.mxu0 %v1501_v34  ;;  %1546 = vmatprep.subr.bf16.mxu1 %v1501_v34  ;;  %v526_v43 = vld [vmem:[%s1891_s14 + $0x20] sm:$0xff]  ;;  %v336_v47 = vld [vmem:[%s2246_s0 + $0x68] sm:$0xff]  ;;  %v1509_v50 = vpack.c.bf16 %v545_v46, %v544_v45  ;;  %v528_v51 = vld [vmem:[%s1891_s14 + $0x30] sm:$0xff]  ;;  %v355_v34 = vlaneseq }
  0x4d   : > { %396 = vperm.xlu1 %1641, %v334_v19   ;;  %372 = vperm.xlu0 %1640, %v326_v20   ;;  %v328_v48 = vld [vmem:[%s2246_s0 + $0x28] sm:$0xff]  ;;  %v1507_v49 = vpack.c.bf16 %v527_v44, %v526_v43  ;;  %v529_v52 = vld [vmem:[%s1891_s14 + $0x38] sm:$0xff]  ;;  %v546_v53 = vld [vmem:[%s1891_s14 + $0xc0] sm:$0xff] }
  0x4e   : > { %v547_v54 = vld [vmem:[%s1891_s14 + $0xc8] sm:$0xff]  ;;  %v337_v55 = vld [vmem:[%s2246_s0 + $0x70] sm:$0xff]  ;;  %v1511_v57 = vpack.c.bf16 %v529_v52, %v528_v51  ;;  %v530_v59 = vld [vmem:[%s1891_s14 + $0x40] sm:$0xff]  ;;  %v2065_v35 = vand.u32 127, %v355_v34 }
  0x4f   : > { %1504 = vmatpush3.bf16.msra.mxu0 %v1503_v41  ;;  %1554 = vmatpush3.bf16.msra.mxu1 %v1503_v41  ;;  %v329_v56 = vld [vmem:[%s2246_s0 + $0x30] sm:$0xff]  ;;  %v1513_v58 = vpack.c.bf16 %v547_v54, %v546_v53  ;;  %v531_v60 = vld [vmem:[%s1891_s14 + $0x48] sm:$0xff]  ;;  %v549_v62 = vld [vmem:[%s1891_s14 + $0xd8] sm:$0xff] }
  0x50   : > { %1506 = vmatprep.subr.bf16.mxu0 %v1505_v42  ;;  %1547 = vmatprep.subr.bf16.mxu1 %v1505_v42  ;;  %v548_v61 = vld [vmem:[%s1891_s14 + $0xd0] sm:$0xff]  ;;  %v338_v63 = vld [vmem:[%s2246_s0 + $0x78] sm:$0xff]  ;;  %v1515_v1 = vpack.c.bf16 %v531_v60, %v530_v59  ;;  %v550_v5 = vld [vmem:[%s1891_s14 + $0xe0] sm:$0xff]  ;;  %v357_v36 = vadd.s32 128, %v2065_v35  ;;  %v2070_v38 = vadd.s32 %v359_v37, %v2065_v35  ;;  %v1761_v42 = vmov 1.0  }
  0x51   : > { %399 = vperm.xlu1 %1641, %v335_v39   ;;  %375 = vperm.xlu0 %1640, %v327_v40   ;;  %v330_v0 = vld [vmem:[%s2246_s0 + $0x38] sm:$0xff]  ;;  %v1517_v2 = vpack.c.bf16 %v549_v62, %v548_v61  ;;  %v532_v3 = vld [vmem:[%s1891_s14 + $0x50] sm:$0xff]  ;;  %v551_v6 = vld [vmem:[%s1891_s14 + $0xe8] sm:$0xff] }
  0x52   : > { %v533_v4 = vld [vmem:[%s1891_s14 + $0x58] sm:$0xff]  ;;  %v1521_v19 = vpack.c.bf16 %v551_v6, %v550_v5  ;;  %v534_v20 = vld [vmem:[%s1891_s14 + $0x60] sm:$0xff]  ;;  %v535_v26 = vld [vmem:[%s1891_s14 + $0x68] sm:$0xff]  ;;  %v2072_v39 = vadd.s32 %v359_v37, %v357_v36 }
  0x53   : > { %1508 = vmatpush3.bf16.msra.mxu0 %v1507_v49  ;;  %1555 = vmatpush3.bf16.msra.mxu1 %v1507_v49  ;;  %v1519_v7 = vpack.c.bf16 %v533_v4, %v532_v3  ;;  %v552_v27 = vld [vmem:[%s1891_s14 + $0xf0] sm:$0xff]  ;;  %v553_v28 = vld [vmem:[%s1891_s14 + $0xf8] sm:$0xff]  ;;  %v1523_v29 = vpack.c.bf16 %v535_v26, %v534_v20 }
  0x54   : > { %1510 = vmatprep.subr.bf16.mxu0 %v1509_v50  ;;  %1548 = vmatprep.subr.bf16.mxu1 %v1509_v50  ;;  %v1525_v30 = vpack.c.bf16 %v553_v28, %v552_v27  ;;  %v536_v31 = vld [vmem:[%s1891_s14 + $0x70] sm:$0xff]  ;;  %v537_v32 = vld [vmem:[%s1891_s14 + $0x78] sm:$0xff]  ;;  %v515_v28 = vld [vmem:[#allocation2 + $0x48] sm:$0xff]  ;;  %s1314_s14 = sshll.u32 (!%p1313_p7), %s1746_s18, 6 }
  0x55   : > { %402 = vperm.xlu1 %1641, %v336_v47   ;;  %378 = vperm.xlu0 %1640, %v328_v48   ;;  %v1527_v33 = vpack.c.bf16 %v537_v32, %v536_v31  ;;  %v508_v26 = vld [vmem:[#allocation2 + $0x10] sm:$0xff]  ;;  %v509_v37 = vld [vmem:[#allocation2 + $0x18] sm:$0xff] }
  0x57   : > { %1512 = vmatpush3.bf16.msra.mxu0 %v1511_v57  ;;  %1556 = vmatpush3.bf16.msra.mxu1 %v1511_v57 }
  0x58   : > { %1514 = vmatprep.subr.bf16.mxu0 %v1513_v58  ;;  %1549 = vmatprep.subr.bf16.mxu1 %v1513_v58  ;;  %v506_v58 = vld [vmem:[#allocation2] sm:$0xff] }
  0x59   : > { %405 = vperm.xlu1 %1641, %v337_v55   ;;  %381 = vperm.xlu0 %1640, %v329_v56  }
  0x5b   : > { %1516 = vmatpush3.bf16.msra.mxu0 %v1515_v1  ;;  %1557 = vmatpush3.bf16.msra.mxu1 %v1515_v1 }
  0x5c   : > { %1518 = vmatprep.subr.bf16.mxu0 %v1517_v2  ;;  %1550 = vmatprep.subr.bf16.mxu1 %v1517_v2  ;;  %v514_v2 = vld [vmem:[#allocation2 + $0x40] sm:$0xff] }
  0x5d   : > { %408 = vperm.xlu1 %1641, %v338_v63   ;;  %384 = vperm.xlu0 %1640, %v330_v0   ;;  %v507_v0 = vld [vmem:[#allocation2 + $0x8] sm:$0xff] }
  0x5f   : > { %1520 = vmatpush3.bf16.msra.mxu0 %v1519_v7  ;;  %1558 = vmatpush3.bf16.msra.mxu1 %v1519_v7 }
  0x60   : > { %1522 = vmatprep.subr.bf16.mxu0 %v1521_v19  ;;  %1551 = vmatprep.subr.bf16.mxu1 %v1521_v19 }
  0x63   : > { %1524 = vmatpush3.bf16.msra.mxu0 %v1523_v29  ;;  %1559 = vmatpush3.bf16.msra.mxu1 %v1523_v29 }
  0x64   : > { %1526 = vmatprep.subr.bf16.mxu0 %v1525_v30  ;;  %1552 = vmatprep.subr.bf16.mxu1 %v1525_v30 }
  0x67   : > { %1528 = vmatpush3.bf16.msra.mxu0 %v1527_v33  ;;  %1560 = vmatpush3.bf16.msra.mxu1 %v1527_v33 }
  0xc0   : > { %v367_v40 = vpop.permute.xlu1 %366  ;;  %v364_v41 = vpop.permute.xlu0 %363 }
  0xc1   : > { %vm413_vm0 = vcmp.eq.s32.totalorder %v367_v40, %v2072_v39  ;;  %vm410_vm1 = vcmp.eq.s32.totalorder %v364_v41, %v2070_v38  ;;  %vm411_vm2 = vcmp.eq.s32.totalorder %v364_v41, %v2072_v39  ;;  %vm412_vm3 = vcmp.eq.s32.totalorder %v367_v40, %v2070_v38 }
  0xc2   : > { %1281 = vmatprep.mubr.msk.f32.mxu0 %vm411_vm2, %v1761_v42 }
  0xc3   : > { %1282 = vmatmul.mubr.msk.f32.vlgmr.msra.gmra.mrb[0].mxu0 %vm410_vm1, %v1761_v42 }
  0xc4   : > { %v391_v43 = vpop.permute.xlu1 %390  ;;  %v388_v44 = vpop.permute.xlu0 %387  ;;  %1283 = vmatprep.mubr.msk.f32.mxu0 %vm413_vm0, %v1761_v42 }
  0xc5   : > { %vm426_vm4 = vcmp.eq.s32.totalorder %v388_v44, %v2070_v38  ;;  %vm427_vm5 = vcmp.eq.s32.totalorder %v388_v44, %v2072_v39  ;;  %vm429_vm6 = vcmp.eq.s32.totalorder %v391_v43, %v2072_v39  ;;  %vm428_vm9 = vcmp.eq.s32.totalorder %v391_v43, %v2070_v38 }
  0xc6   : > { %1297 = vmatprep.mubr.msk.f32.mxu1 %vm427_vm5, %v1761_v42 }
  0xc7   : > { %1284 = vmatmul.mubr.msk.f32.gmra.mrb[2].mxu0 %vm412_vm3, %v1761_v42  ;;  %1298 = vmatmul.mubr.msk.f32.vlgmr.msra.gmra.mrb[0].mxu1 %vm426_vm4, %v1761_v42 }
  0xc8   : > { %v394_v45 = vpop.permute.xlu1 %393  ;;  %1299 = vmatprep.mubr.msk.f32.mxu1 %vm429_vm6, %v1761_v42  ;;  %v370_v46 = vpop.permute.xlu0 %369 }
  0xc9   : > { %vm414_vm7 = vcmp.eq.s32.totalorder %v370_v46, %v2070_v38  ;;  %vm415_vm8 = vcmp.eq.s32.totalorder %v370_v46, %v2072_v39  ;;  %vm431_vm10 = vcmp.eq.s32.totalorder %v394_v45, %v2072_v39  ;;  %vm430_vm13 = vcmp.eq.s32.totalorder %v394_v45, %v2070_v38 }
  0xca   : > { %1285 = vmatprep.mubr.msk.f32.mxu0 %vm415_vm8, %v1761_v42 }
  0xcb   : > { %1286 = vmatmul.mubr.msk.f32.gmra.mrb[4].mxu0 %vm414_vm7, %v1761_v42  ;;  %1300 = vmatmul.mubr.msk.f32.gmra.mrb[2].mxu1 %vm428_vm9, %v1761_v42 }
  0xcc   : > { %v397_v47 = vpop.permute.xlu1 %396  ;;  %1301 = vmatprep.mubr.msk.f32.mxu1 %vm431_vm10, %v1761_v42  ;;  %v373_v48 = vpop.permute.xlu0 %372 }
  0xcd   : > { %vm416_vm11 = vcmp.eq.s32.totalorder %v373_v48, %v2070_v38  ;;  %vm417_vm12 = vcmp.eq.s32.totalorder %v373_v48, %v2072_v39  ;;  %vm433_vm14 = vcmp.eq.s32.totalorder %v397_v47, %v2072_v39  ;;  %vm432_vm1 = vcmp.eq.s32.totalorder %v397_v47, %v2070_v38  ;;  %v510_v47 = vld [vmem:[#allocation2 + $0x20] sm:$0xff] }
  0xce   : > { %1287 = vmatprep.mubr.msk.f32.mxu0 %vm417_vm12, %v1761_v42 }
  0xcf   : > { %1288 = vmatmul.mubr.msk.f32.gmra.mrb[6].mxu0 %vm416_vm11, %v1761_v42  ;;  %1302 = vmatmul.mubr.msk.f32.gmra.mrb[4].mxu1 %vm430_vm13, %v1761_v42 }
  0xd0   : > { %v400_v49 = vpop.permute.xlu1 %399  ;;  %1303 = vmatprep.mubr.msk.f32.mxu1 %vm433_vm14, %v1761_v42  ;;  %v376_v50 = vpop.permute.xlu0 %375 }
  0xd1   : > { %vm418_vm15 = vcmp.eq.s32.totalorder %v376_v50, %v2070_v38  ;;  %vm419_vm0 = vcmp.eq.s32.totalorder %v376_v50, %v2072_v39  ;;  %vm435_vm2 = vcmp.eq.s32.totalorder %v400_v49, %v2072_v39  ;;  %vm434_vm5 = vcmp.eq.s32.totalorder %v400_v49, %v2070_v38  ;;  %v517_v49 = vld [vmem:[#allocation2 + $0x58] sm:$0xff] }
  0xd2   : > { %1289 = vmatprep.mubr.msk.f32.mxu0 %vm419_vm0, %v1761_v42  ;;  %vm858_vm0 = vcmask (!%p1313_p7), 523264  }
  0xd3   : > { %1290 = vmatmul.mubr.msk.f32.gmra.mrb[8].mxu0 %vm418_vm15, %v1761_v42  ;;  %1304 = vmatmul.mubr.msk.f32.gmra.mrb[6].mxu1 %vm432_vm1, %v1761_v42 }
  0xd4   : > { %v403_v51 = vpop.permute.xlu1 %402  ;;  %1305 = vmatprep.mubr.msk.f32.mxu1 %vm435_vm2, %v1761_v42  ;;  %v379_v52 = vpop.permute.xlu0 %378 }
  0xd5   : > { %vm420_vm3 = vcmp.eq.s32.totalorder %v379_v52, %v2070_v38  ;;  %vm421_vm4 = vcmp.eq.s32.totalorder %v379_v52, %v2072_v39  ;;  %vm437_vm6 = vcmp.eq.s32.totalorder %v403_v51, %v2072_v39  ;;  %vm436_vm9 = vcmp.eq.s32.totalorder %v403_v51, %v2070_v38 }
  0xd6   : > { %1291 = vmatprep.mubr.msk.f32.mxu0 %vm421_vm4, %v1761_v42 }
  0xd7   : > { %1292 = vmatmul.mubr.msk.f32.gmra.mrb[10].mxu0 %vm420_vm3, %v1761_v42  ;;  %1306 = vmatmul.mubr.msk.f32.gmra.mrb[8].mxu1 %vm434_vm5, %v1761_v42 }
  0xd8   : > { %v406_v53 = vpop.permute.xlu1 %405  ;;  %1307 = vmatprep.mubr.msk.f32.mxu1 %vm437_vm6, %v1761_v42  ;;  %v382_v54 = vpop.permute.xlu0 %381 }
  0xd9   : > { %vm422_vm7 = vcmp.eq.s32.totalorder %v382_v54, %v2070_v38  ;;  %vm423_vm8 = vcmp.eq.s32.totalorder %v382_v54, %v2072_v39  ;;  %vm439_vm10 = vcmp.eq.s32.totalorder %v406_v53, %v2072_v39  ;;  %vm438_vm13 = vcmp.eq.s32.totalorder %v406_v53, %v2070_v38 }
  0xda   : > { %1293 = vmatprep.mubr.msk.f32.mxu0 %vm423_vm8, %v1761_v42 }
  0xdb   : > { %1294 = vmatmul.mubr.msk.f32.gmra.mrb[12].mxu0 %vm422_vm7, %v1761_v42  ;;  %1308 = vmatmul.mubr.msk.f32.gmra.mrb[10].mxu1 %vm436_vm9, %v1761_v42 }
  0xdc   : > { %v409_v55 = vpop.permute.xlu1 %408  ;;  %1309 = vmatprep.mubr.msk.f32.mxu1 %vm439_vm10, %v1761_v42  ;;  %v385_v56 = vpop.permute.xlu0 %384 }
  0xdd   : > { %vm424_vm11 = vcmp.eq.s32.totalorder %v385_v56, %v2070_v38  ;;  %vm425_vm12 = vcmp.eq.s32.totalorder %v385_v56, %v2072_v39  ;;  %vm441_vm14 = vcmp.eq.s32.totalorder %v409_v55, %v2072_v39  ;;  %vm440_vm15 = vcmp.eq.s32.totalorder %v409_v55, %v2070_v38  ;;  %v516_v39 = vld [vmem:[#allocation2 + $0x50] sm:$0xff] }
  0xde   : > { %1295 = vmatprep.mubr.msk.f32.mxu0 %vm425_vm12, %v1761_v42 }
  0xdf   : > { %1296 = vmatmul.mubr.msk.f32.gmra.mrb[14].mxu0 %vm424_vm11, %v1761_v42  ;;  %1310 = vmatmul.mubr.msk.f32.gmra.mrb[12].mxu1 %vm438_vm13, %v1761_v42 }
  0xe0   : > { %1311 = vmatprep.mubr.msk.f32.mxu1 %vm441_vm14, %v1761_v42 }
  0xe3   : > { %1312 = vmatmul.mubr.msk.f32.gmra.mrb[14].mxu1 %vm440_vm15, %v1761_v42 }
 0x196   : > { %v1385_v57 = vpop.f32.mrb[0].mxu0 }
 0x197   : > { %v1386_v59 = vpop.f32.mrb[1].mxu0 }
 0x198   : > { %v1387_v60 = vadd.f32 %v1386_v59, %v1385_v57  ;;  %v511_v57 = vld [vmem:[#allocation2 + $0x28] sm:$0xff]  ;;  %v518_v59 = vld [vmem:[#allocation2 + $0x60] sm:$0xff] }
 0x19a   : > { %v699_v61 = vadd.f32 %v1387_v60, %v506_v58  ;;  %v1388_v62 = vpop.f32.mrb[2].mxu0  ;;  %v1409_v63 = vpop.f32.mrb[0].mxu1 }
 0x19b   : > { %v1389_v1 = vpop.f32.mrb[3].mxu0  ;;  %v1410_v3 = vpop.f32.mrb[1].mxu1 }
 0x19c   : > { %715 = vst [vmem:[#allocation2] sm:$0xff] %v699_v61  ;;  %v1390_v4 = vadd.f32 %v1389_v1, %v1388_v62  ;;  %v1411_v5 = vadd.f32 %v1410_v3, %v1409_v63  ;;  %v512_v3 = vld [vmem:[#allocation2 + $0x30] sm:$0xff] }
 0x19e   : > { %v700_v6 = vadd.f32 %v1390_v4, %v507_v0  ;;  %v707_v7 = vadd.f32 %v1411_v5, %v514_v2  ;;  %v1391_v19 = vpop.f32.mrb[4].mxu0  ;;  %v1412_v20 = vpop.f32.mrb[2].mxu1  ;;  %v519_v5 = vld [vmem:[#allocation2 + $0x68] sm:$0xff] }
 0x19f   : > { %v1392_v27 = vpop.f32.mrb[5].mxu0  ;;  %v1413_v29 = vpop.f32.mrb[3].mxu1 }
 0x1a0   : > { %716 = vst [vmem:[#allocation2 + $0x8] sm:$0xff] %v700_v6  ;;  %723 = vst [vmem:[#allocation2 + $0x40] sm:$0xff] %v707_v7  ;;  %v1393_v30 = vadd.f32 %v1392_v27, %v1391_v19  ;;  %v1414_v31 = vadd.f32 %v1413_v29, %v1412_v20  ;;  %v513_v29 = vld [vmem:[#allocation2 + $0x38] sm:$0xff] }
 0x1a2   : > { %v701_v32 = vadd.f32 %v1393_v30, %v508_v26  ;;  %v708_v33 = vadd.f32 %v1414_v31, %v515_v28  ;;  %v1394_v34 = vpop.f32.mrb[6].mxu0  ;;  %v1415_v36 = vpop.f32.mrb[4].mxu1  ;;  %v520_v31 = vld [vmem:[#allocation2 + $0x70] sm:$0xff] }
 0x1a3   : > { %v1395_v38 = vpop.f32.mrb[7].mxu0  ;;  %v1416_v40 = vpop.f32.mrb[5].mxu1 }
 0x1a4   : > { %717 = vst [vmem:[#allocation2 + $0x10] sm:$0xff] %v701_v32  ;;  %724 = vst [vmem:[#allocation2 + $0x48] sm:$0xff] %v708_v33  ;;  %v1396_v41 = vadd.f32 %v1395_v38, %v1394_v34  ;;  %v1417_v42 = vadd.f32 %v1416_v40, %v1415_v36 }
 0x1a6   : > { %v702_v43 = vadd.f32 %v1396_v41, %v509_v37  ;;  %v709_v44 = vadd.f32 %v1417_v42, %v516_v39  ;;  %v1397_v45 = vpop.f32.mrb[8].mxu0  ;;  %v1418_v46 = vpop.f32.mrb[6].mxu1  ;;  %v521_v39 = vld [vmem:[#allocation2 + $0x78] sm:$0xff] }
 0x1a7   : > { %v1398_v48 = vpop.f32.mrb[9].mxu0  ;;  %v1419_v50 = vpop.f32.mrb[7].mxu1 }
 0x1a8   : > { %718 = vst [vmem:[#allocation2 + $0x18] sm:$0xff] %v702_v43  ;;  %725 = vst [vmem:[#allocation2 + $0x50] sm:$0xff] %v709_v44  ;;  %v1399_v51 = vadd.f32 %v1398_v48, %v1397_v45  ;;  %v1420_v52 = vadd.f32 %v1419_v50, %v1418_v46  ;;  %v850_v43 = vld [vmem:[%s1902_s23] sm:$0xff] (!%p1313_p7)  ;;  %v851_v44 = vld [vmem:[%s1902_s23 + $0x8] sm:$0xff] (!%p1313_p7)  ;;  %v1762_v46 = vmov (!%p1313_p7), 0  }
 0x1a9   : > { %v852_v45 = vld [vmem:[%s1902_s23 + $0x10] sm:$0xff] (!%p1313_p7)  ;;  %1643 = vset.pattern.permute.xlu1 (!%p1313_p7), %v1762_v46  ;;  %1642 = vset.pattern.permute.xlu0 (!%p1313_p7), %v1762_v46  ;;  %v853_v48 = vld [vmem:[%s1902_s23 + $0x18] sm:$0xff] (!%p1313_p7)  ;;  %v854_v50 = vld [vmem:[%s1902_s23 + $0x20] sm:$0xff] (!%p1313_p7) }
 0x1aa   : > { %v703_v53 = vadd.f32 %v1399_v51, %v510_v47  ;;  %v710_v54 = vadd.f32 %v1420_v52, %v517_v49  ;;  %v1400_v55 = vpop.f32.mrb[10].mxu0  ;;  %v1421_v56 = vpop.f32.mrb[8].mxu1  ;;  %v1529_v47 = vpack.c.bf16 (!%p1313_p7), %v851_v44, %v850_v43  ;;  %742 = vperm.xlu1 (!%p1313_p7), %1643, %v1931_v9   ;;  %739 = vperm.xlu0 (!%p1313_p7), %1642, %v1926_v8   ;;  %v855_v51 = vld [vmem:[%s1902_s23 + $0x28] sm:$0xff] (!%p1313_p7)  ;;  %v736_v9 = vstv (!%p1313_p7), %s1314_s14 }
 0x1ab   : > { %v1401_v58 = vpop.f32.mrb[11].mxu0  ;;  %v1422_v60 = vpop.f32.mrb[9].mxu1  ;;  %v1533_v49 = vpack.c.bf16 (!%p1313_p7), %v853_v48, %v852_v45  ;;  %v1537_v52 = vpack.c.bf16 (!%p1313_p7), %v855_v51, %v854_v50 }
 0x1ac   : > { %719 = vst [vmem:[#allocation2 + $0x20] sm:$0xff] %v703_v53  ;;  %726 = vst [vmem:[#allocation2 + $0x58] sm:$0xff] %v710_v54  ;;  %v1402_v61 = vadd.f32 %v1401_v58, %v1400_v55  ;;  %v1423_v62 = vadd.f32 %v1422_v60, %v1421_v56  ;;  %1530 = vmatprep.subr.bf16.mxu0 (!%p1313_p7), %v1529_v47  ;;  %1561 = vmatprep.subr.bf16.mxu1 (!%p1313_p7), %v1529_v47  ;;  %v856_v53 = vld [vmem:[%s1902_s23 + $0x30] sm:$0xff] (!%p1313_p7)  ;;  %v857_v54 = vld [vmem:[%s1902_s23 + $0x38] sm:$0xff] (!%p1313_p7) }
 0x1ad   : > { %1532 = vmatpush3.bf16.msra.mxu0 (!%p1313_p7), %v1529_v47  ;;  %1565 = vmatpush3.bf16.msra.mxu1 (!%p1313_p7), %v1529_v47  ;;  %v1541_v8 = vpack.c.bf16 (!%p1313_p7), %v857_v54, %v856_v53 }
 0x1ae   : > { %v704_v63 = vadd.f32 %v1402_v61, %v511_v57  ;;  %v711_v0 = vadd.f32 %v1423_v62, %v518_v59  ;;  %v1403_v1 = vpop.f32.mrb[12].mxu0  ;;  %v1424_v2 = vpop.f32.mrb[10].mxu1  ;;  %1534 = vmatprep.subr.bf16.mxu0 (!%p1313_p7), %v1533_v49  ;;  %1562 = vmatprep.subr.bf16.mxu1 (!%p1313_p7), %v1533_v49 }
 0x1af   : > { %v1404_v4 = vpop.f32.mrb[13].mxu0  ;;  %v1425_v6 = vpop.f32.mrb[11].mxu1  ;;  %766 = vperm.xlu1 (!%p1313_p7), %1643, %v1971_v17   ;;  %763 = vperm.xlu0 (!%p1313_p7), %1642, %v1966_v16  }
 0x1b0   : > { %720 = vst [vmem:[#allocation2 + $0x28] sm:$0xff] %v704_v63  ;;  %727 = vst [vmem:[#allocation2 + $0x60] sm:$0xff] %v711_v0  ;;  %v1405_v7 = vadd.f32 %v1404_v4, %v1403_v1  ;;  %v1426_v19 = vadd.f32 %v1425_v6, %v1424_v2 }
 0x1b1   : > { %1536 = vmatpush3.bf16.msra.mxu0 (!%p1313_p7), %v1533_v49  ;;  %1566 = vmatpush3.bf16.msra.mxu1 (!%p1313_p7), %v1533_v49 }
 0x1b2   : > { %v705_v20 = vadd.f32 %v1405_v7, %v512_v3  ;;  %v712_v26 = vadd.f32 %v1426_v19, %v519_v5  ;;  %v1406_v27 = vpop.f32.mrb[14].mxu0  ;;  %v1427_v28 = vpop.f32.mrb[12].mxu1  ;;  %1538 = vmatprep.subr.bf16.mxu0 (!%p1313_p7), %v1537_v52  ;;  %1563 = vmatprep.subr.bf16.mxu1 (!%p1313_p7), %v1537_v52 }
 0x1b3   : > { %v1407_v30 = vpop.f32.mrb[15].mxu0  ;;  %v1428_v32 = vpop.f32.mrb[13].mxu1  ;;  %769 = vperm.xlu1 (!%p1313_p7), %1643, %v1976_v18   ;;  %745 = vperm.xlu0 (!%p1313_p7), %1642, %v1936_v10   ;;  %v2165_v10 = vadd.s32 (!%p1313_p7), %v736_v9, %v2065_v35  ;;  %v838_v53 = vld [vmem:[#allocation2 + $0x20] sm:$0xff] (!%p1313_p7) }
 0x1b4   : > { %721 = vst [vmem:[#allocation2 + $0x30] sm:$0xff] %v705_v20  ;;  %728 = vst [vmem:[#allocation2 + $0x68] sm:$0xff] %v712_v26  ;;  %v1408_v33 = vadd.f32 %v1407_v30, %v1406_v27  ;;  %v1429_v34 = vadd.f32 %v1428_v32, %v1427_v28  ;;  %v835_v26 = vld [vmem:[#allocation2 + $0x8] sm:$0xff] (!%p1313_p7)  ;;  %v834_v27 = vld [vmem:[#allocation2] sm:$0xff] (!%p1313_p7) }
 0x1b5   : > { %1540 = vmatpush3.bf16.msra.mxu0 (!%p1313_p7), %v1537_v52  ;;  %1567 = vmatpush3.bf16.msra.mxu1 (!%p1313_p7), %v1537_v52  ;;  %v843_v32 = vld [vmem:[#allocation2 + $0x48] sm:$0xff] (!%p1313_p7) }
 0x1b6   : > { %v706_v36 = vadd.f32 %v1408_v33, %v513_v29  ;;  %v713_v37 = vadd.f32 %v1429_v34, %v520_v31  ;;  %v1430_v38 = vpop.f32.mrb[14].mxu1  ;;  %734 = sbr.rel (%p1313_p7) target bundleno = 801 (0x321), region = 48  ;;  %1542 = vmatprep.subr.bf16.mxu0 (!%p1313_p7), %v1541_v8  ;;  %1564 = vmatprep.subr.bf16.mxu1 (!%p1313_p7), %v1541_v8  ;;  %v842_v33 = vld [vmem:[#allocation2 + $0x40] sm:$0xff] (!%p1313_p7) }
 0x1b7   : > { %v1431_v40 = vpop.f32.mrb[15].mxu1  ;;  %772 = vperm.xlu1 (!%p1313_p7), %1643, %v1987_v21   ;;  %748 = vperm.xlu0 (!%p1313_p7), %1642, %v1941_v11   ;;  %v839_v51 = vld [vmem:[#allocation2 + $0x28] sm:$0xff] (!%p1313_p7)  ;;  %v846_v54 = vld [vmem:[#allocation2 + $0x60] sm:$0xff] (!%p1313_p7) }
 0x1b8   : > { %722 = vst [vmem:[#allocation2 + $0x38] sm:$0xff] %v706_v36  ;;  %729 = vst [vmem:[#allocation2 + $0x70] sm:$0xff] %v713_v37  ;;  %v1432_v41 = vadd.f32 %v1431_v40, %v1430_v38  ;;  %v845_v40 = vld [vmem:[#allocation2 + $0x58] sm:$0xff] (!%p1313_p7) }
 0x1b9   : > { %1544 = vmatpush3.bf16.msra.mxu0 (!%p1313_p7), %v1541_v8  ;;  %1568 = vmatpush3.bf16.msra.mxu1 (!%p1313_p7), %v1541_v8 }
 0x1ba   : > { %v714_v42 = vadd.f32 %v1432_v41, %v521_v39  ;;  %v837_v39 = vld [vmem:[#allocation2 + $0x18] sm:$0xff] (!%p1313_p7)  ;;  %v836_v41 = vld [vmem:[#allocation2 + $0x10] sm:$0xff] (!%p1313_p7) }
 0x1bb   : > { %775 = vperm.xlu1 (!%p1313_p7), %1643, %v1992_v22   ;;  %751 = vperm.xlu0 (!%p1313_p7), %1642, %v1946_v12   ;;  %v1763_v12 = vmov (!%p1313_p7), 0.0   ;;  %v847_v52 = vld [vmem:[#allocation2 + $0x68] sm:$0xff] (!%p1313_p7) }
 0x1bc   : > { %730 = vst [vmem:[#allocation2 + $0x78] sm:$0xff] %v714_v42  ;;  %v844_v42 = vld [vmem:[#allocation2 + $0x50] sm:$0xff] (!%p1313_p7) }
 0x1bf   : > { %778 = vperm.xlu1 %1643, %v1997_v23   ;;  %754 = vperm.xlu0 %1642, %v1951_v13  }
 0x1c3   : > { %781 = vperm.xlu1 %1643, %v2002_v24   ;;  %757 = vperm.xlu0 %1642, %v1956_v14  }
 0x1c7   : > { %784 = vperm.xlu1 %1643, %v2007_v25   ;;  %760 = vperm.xlu0 %1642, %v1961_v15  }
 0x229   : > { %v743_v11 = vpop.permute.xlu1 %742  ;;  %v740_v16 = vpop.permute.xlu0 %739 }
 0x22a   : > { %vm787_vm1 = vcmp.eq.s32.totalorder %v743_v11, %v2165_v10  ;;  %vm786_vm2 = vcmp.eq.s32.totalorder %v740_v16, %v2165_v10 }
 0x22b   : > { %v1316_v13 = vsel %vm787_vm1, 1.0, %v1763_v12  ;;  %v1315_v17 = vsel %vm786_vm2, 1.0, %v1763_v12 }
 0x22c   : > { %1473 = vmatprep.mubr.msk.f32.mxu0 %vm858_vm0, %v1315_v17 }
 0x22d   : > { %1474 = vmatmul.mubr.msk.f32.vlgmr.msra.gmra.mrb[0].mxu0 %vm858_vm0, %v1316_v13 }
 0x22e   : > { %v767_v14 = vpop.permute.xlu1 %766  ;;  %v764_v18 = vpop.permute.xlu0 %763 }
 0x22f   : > { %vm795_vm3 = vcmp.eq.s32.totalorder %v767_v14, %v2165_v10  ;;  %vm794_vm4 = vcmp.eq.s32.totalorder %v764_v18, %v2165_v10  ;;  %v841_v14 = vld [vmem:[#allocation2 + $0x38] sm:$0xff] }
 0x230   : > { %v1324_v15 = vsel %vm795_vm3, 1.0, %v1763_v12  ;;  %v1323_v21 = vsel %vm794_vm4, 1.0, %v1763_v12  ;;  %v849_v18 = vld [vmem:[#allocation2 + $0x78] sm:$0xff] }
 0x231   : > { %1485 = vmatprep.mubr.msk.f32.mxu1 %vm858_vm0, %v1323_v21  ;;  %v848_v21 = vld [vmem:[#allocation2 + $0x70] sm:$0xff] }
 0x232   : > { %v770_v22 = vpop.permute.xlu1 %769  ;;  %v746_v23 = vpop.permute.xlu0 %745  ;;  %1486 = vmatmul.mubr.msk.f32.vlgmr.msra.gmra.mrb[0].mxu1 %vm858_vm0, %v1324_v15  ;;  %v840_v15 = vld [vmem:[#allocation2 + $0x30] sm:$0xff] }
 0x233   : > { %vm796_vm5 = vcmp.eq.s32.totalorder %v770_v22, %v2165_v10  ;;  %vm788_vm6 = vcmp.eq.s32.totalorder %v746_v23, %v2165_v10 }
 0x234   : > { %v1325_v24 = vsel %vm796_vm5, 1.0, %v1763_v12  ;;  %v1317_v25 = vsel %vm788_vm6, 1.0, %v1763_v12 }
 0x235   : > { %1476 = vmatprep.mubr.msk.f32.mxu0 %vm858_vm0, %v1317_v25  ;;  %1488 = vmatprep.mubr.msk.f32.mxu1 %vm858_vm0, %v1325_v24 }
 0x236   : > { %v773_v35 = vpop.permute.xlu1 %772  ;;  %v749_v55 = vpop.permute.xlu0 %748 }
 0x237   : > { %vm797_vm7 = vcmp.eq.s32.totalorder %v773_v35, %v2165_v10  ;;  %vm789_vm8 = vcmp.eq.s32.totalorder %v749_v55, %v2165_v10 }
 0x238   : > { %v1326_v56 = vsel %vm797_vm7, 1.0, %v1763_v12  ;;  %v1318_v57 = vsel %vm789_vm8, 1.0, %v1763_v12 }
 0x239   : > { %1477 = vmatmul.mubr.msk.f32.gmra.mrb[2].mxu0 %vm858_vm0, %v1318_v57  ;;  %1489 = vmatmul.mubr.msk.f32.gmra.mrb[2].mxu1 %vm858_vm0, %v1326_v56 }
 0x23a   : > { %v776_v58 = vpop.permute.xlu1 %775  ;;  %v752_v59 = vpop.permute.xlu0 %751 }
 0x23b   : > { %vm798_vm9 = vcmp.eq.s32.totalorder %v776_v58, %v2165_v10  ;;  %vm790_vm10 = vcmp.eq.s32.totalorder %v752_v59, %v2165_v10 }
 0x23c   : > { %v1327_v60 = vsel %vm798_vm9, 1.0, %v1763_v12  ;;  %v1319_v61 = vsel %vm790_vm10, 1.0, %v1763_v12 }
 0x23d   : > { %1479 = vmatprep.mubr.msk.f32.mxu0 %vm858_vm0, %v1319_v61  ;;  %1491 = vmatprep.mubr.msk.f32.mxu1 %vm858_vm0, %v1327_v60 }
 0x23e   : > { %v779_v62 = vpop.permute.xlu1 %778  ;;  %v755_v63 = vpop.permute.xlu0 %754 }
 0x23f   : > { %vm799_vm11 = vcmp.eq.s32.totalorder %v779_v62, %v2165_v10  ;;  %vm791_vm12 = vcmp.eq.s32.totalorder %v755_v63, %v2165_v10 }
 0x240   : > { %v1328_v0 = vsel %vm799_vm11, 1.0, %v1763_v12  ;;  %v1320_v1 = vsel %vm791_vm12, 1.0, %v1763_v12 }
 0x241   : > { %1480 = vmatmul.mubr.msk.f32.gmra.mrb[4].mxu0 %vm858_vm0, %v1320_v1  ;;  %1492 = vmatmul.mubr.msk.f32.gmra.mrb[4].mxu1 %vm858_vm0, %v1328_v0 }
 0x242   : > { %v782_v2 = vpop.permute.xlu1 %781  ;;  %v758_v3 = vpop.permute.xlu0 %757 }
 0x243   : > { %vm800_vm13 = vcmp.eq.s32.totalorder %v782_v2, %v2165_v10  ;;  %vm792_vm14 = vcmp.eq.s32.totalorder %v758_v3, %v2165_v10 }
 0x244   : > { %v1329_v4 = vsel %vm800_vm13, 1.0, %v1763_v12  ;;  %v1321_v5 = vsel %vm792_vm14, 1.0, %v1763_v12 }
 0x245   : > { %1482 = vmatprep.mubr.msk.f32.mxu0 %vm858_vm0, %v1321_v5  ;;  %1494 = vmatprep.mubr.msk.f32.mxu1 %vm858_vm0, %v1329_v4 }
 0x246   : > { %v785_v6 = vpop.permute.xlu1 %784  ;;  %v761_v7 = vpop.permute.xlu0 %760 }
 0x247   : > { %vm801_vm15 = vcmp.eq.s32.totalorder %v785_v6, %v2165_v10  ;;  %vm793_vm1 = vcmp.eq.s32.totalorder %v761_v7, %v2165_v10 }
 0x248   : > { %v1330_v19 = vsel %vm801_vm15, 1.0, %v1763_v12  ;;  %v1322_v20 = vsel %vm793_vm1, 1.0, %v1763_v12 }
 0x249   : > { %1483 = vmatmul.mubr.msk.f32.gmra.mrb[6].mxu0 %vm858_vm0, %v1322_v20  ;;  %1495 = vmatmul.mubr.msk.f32.gmra.mrb[6].mxu1 %vm858_vm0, %v1330_v19 }
 0x300   : > { %v1475_v28 = vpop.f32.mrb[0].mxu0 }
 0x301   : > { %v1053_v29 = vadd.f32 %v1475_v28, %v835_v26  ;;  %v973_v30 = vpop.f32.mrb[1].mxu0 }
 0x302   : > { %v1052_v31 = vadd.f32 %v973_v30, %v834_v27 }
 0x303   : > { %1069 = vst [vmem:[#allocation2 + $0x8] sm:$0xff] %v1053_v29 }
 0x304   : > { %1068 = vst [vmem:[#allocation2] sm:$0xff] %v1052_v31 }
 0x305   : > { %v1487_v34 = vpop.f32.mrb[0].mxu1 }
 0x306   : > { %v1061_v36 = vadd.f32 %v1487_v34, %v843_v32  ;;  %v1013_v37 = vpop.f32.mrb[1].mxu1 }
 0x307   : > { %v1060_v38 = vadd.f32 %v1013_v37, %v842_v33 }
 0x308   : > { %1077 = vst [vmem:[#allocation2 + $0x48] sm:$0xff] %v1061_v36 }
 0x309   : > { %1076 = vst [vmem:[#allocation2 + $0x40] sm:$0xff] %v1060_v38 }
 0x30c   : > { %v1478_v43 = vpop.f32.mrb[2].mxu0  ;;  %v1490_v44 = vpop.f32.mrb[2].mxu1 }
 0x30d   : > { %v1055_v45 = vadd.f32 %v1478_v43, %v837_v39  ;;  %v1063_v46 = vadd.f32 %v1490_v44, %v845_v40  ;;  %v983_v47 = vpop.f32.mrb[3].mxu0  ;;  %v1023_v48 = vpop.f32.mrb[3].mxu1 }
 0x30e   : > { %v1054_v49 = vadd.f32 %v983_v47, %v836_v41  ;;  %v1062_v50 = vadd.f32 %v1023_v48, %v844_v42 }
 0x30f   : > { %1071 = vst [vmem:[#allocation2 + $0x18] sm:$0xff] %v1055_v45  ;;  %1079 = vst [vmem:[#allocation2 + $0x58] sm:$0xff] %v1063_v46 }
 0x310   : > { %1070 = vst [vmem:[#allocation2 + $0x10] sm:$0xff] %v1054_v49  ;;  %1078 = vst [vmem:[#allocation2 + $0x50] sm:$0xff] %v1062_v50 }
 0x314   : > { %v1481_v8 = vpop.f32.mrb[4].mxu0  ;;  %v1493_v9 = vpop.f32.mrb[4].mxu1 }
 0x315   : > { %v1057_v10 = vadd.f32 %v1481_v8, %v839_v51  ;;  %v1065_v11 = vadd.f32 %v1493_v9, %v847_v52  ;;  %v993_v16 = vpop.f32.mrb[5].mxu0  ;;  %v1033_v12 = vpop.f32.mrb[5].mxu1 }
 0x316   : > { %v1056_v13 = vadd.f32 %v993_v16, %v838_v53  ;;  %v1064_v17 = vadd.f32 %v1033_v12, %v846_v54 }
 0x317   : > { %1073 = vst [vmem:[#allocation2 + $0x28] sm:$0xff] %v1057_v10  ;;  %1081 = vst [vmem:[#allocation2 + $0x68] sm:$0xff] %v1065_v11 }
 0x318   : > { %1072 = vst [vmem:[#allocation2 + $0x20] sm:$0xff] %v1056_v13  ;;  %1080 = vst [vmem:[#allocation2 + $0x60] sm:$0xff] %v1064_v17 }
 0x31c   : > { %v1484_v22 = vpop.f32.mrb[6].mxu0  ;;  %v1496_v23 = vpop.f32.mrb[6].mxu1 }
 0x31d   : > { %v1059_v24 = vadd.f32 %v1484_v22, %v841_v14  ;;  %v1067_v25 = vadd.f32 %v1496_v23, %v849_v18  ;;  %v1003_v35 = vpop.f32.mrb[7].mxu0  ;;  %v1043_v55 = vpop.f32.mrb[7].mxu1 }
 0x31e   : > { %v1058_v56 = vadd.f32 %v1003_v35, %v840_v15  ;;  %v1066_v57 = vadd.f32 %v1043_v55, %v848_v21 }
 0x31f   : > { %1075 = vst [vmem:[#allocation2 + $0x38] sm:$0xff] %v1059_v24  ;;  %1083 = vst [vmem:[#allocation2 + $0x78] sm:$0xff] %v1067_v25 }
 0x320   : > { %1074 = vst [vmem:[#allocation2 + $0x30] sm:$0xff] %v1058_v56  ;;  %1082 = vst [vmem:[#allocation2 + $0x70] sm:$0xff] %v1066_v57 }
 0x321 PF: > { %p1347_p6 = scmp.ne.s32.totalorder %s1746_s18, 1 }
 0x322   : > { %v1088_v58 = vld [vmem:[#allocation2] sm:$0xff] (!%p1347_p6)  ;;  %v1089_v59 = vld [vmem:[#allocation2 + $0x8] sm:$0xff] (!%p1347_p6)  ;;  %v1090_v60 = vld [vmem:[#allocation2 + $0x10] sm:$0xff] (!%p1347_p6) }
 0x323   : > { %1087 = sbr.rel (%p1347_p6) target bundleno = 811 (0x32b), region = 52  ;;  %1104 = vst [vmem:[#allocation6] sm:$0xff] (!%p1347_p6), %v1088_v58  ;;  %1105 = vst [vmem:[#allocation6 + $0x8] sm:$0xff] (!%p1347_p6), %v1089_v59  ;;  %v1091_v61 = vld [vmem:[#allocation2 + $0x18] sm:$0xff] (!%p1347_p6)  ;;  %v1092_v62 = vld [vmem:[#allocation2 + $0x20] sm:$0xff] (!%p1347_p6) }
 0x324   : > { %1106 = vst [vmem:[#allocation6 + $0x10] sm:$0xff] (!%p1347_p6), %v1090_v60  ;;  %v1093_v63 = vld [vmem:[#allocation2 + $0x28] sm:$0xff] (!%p1347_p6)  ;;  %1107 = vst [vmem:[#allocation6 + $0x18] sm:$0xff] (!%p1347_p6), %v1091_v61  ;;  %v1096_v2 = vld [vmem:[#allocation2 + $0x40] sm:$0xff] (!%p1347_p6) }
 0x325   : > { %1108 = vst [vmem:[#allocation6 + $0x20] sm:$0xff] (!%p1347_p6), %v1092_v62  ;;  %1109 = vst [vmem:[#allocation6 + $0x28] sm:$0xff] (!%p1347_p6), %v1093_v63  ;;  %v1097_v3 = vld [vmem:[#allocation2 + $0x48] sm:$0xff] (!%p1347_p6)  ;;  %v1098_v4 = vld [vmem:[#allocation2 + $0x50] sm:$0xff] (!%p1347_p6) }
 0x326   : > { %v1095_v1 = vld [vmem:[#allocation2 + $0x38] sm:$0xff] (!%p1347_p6)  ;;  %1112 = vst [vmem:[#allocation6 + $0x40] sm:$0xff] (!%p1347_p6), %v1096_v2  ;;  %1113 = vst [vmem:[#allocation6 + $0x48] sm:$0xff] (!%p1347_p6), %v1097_v3  ;;  %v1100_v6 = vld [vmem:[#allocation2 + $0x60] sm:$0xff] (!%p1347_p6) }
 0x327   : > { %v1094_v0 = vld [vmem:[#allocation2 + $0x30] sm:$0xff] (!%p1347_p6)  ;;  %1111 = vst [vmem:[#allocation6 + $0x38] sm:$0xff] (!%p1347_p6), %v1095_v1  ;;  %v1099_v5 = vld [vmem:[#allocation2 + $0x58] sm:$0xff] (!%p1347_p6)  ;;  %1114 = vst [vmem:[#allocation6 + $0x50] sm:$0xff] (!%p1347_p6), %v1098_v4 }
 0x328   : > { %1110 = vst [vmem:[#allocation6 + $0x30] sm:$0xff] (!%p1347_p6), %v1094_v0  ;;  %1115 = vst [vmem:[#allocation6 + $0x58] sm:$0xff] (!%p1347_p6), %v1099_v5  ;;  %v1101_v7 = vld [vmem:[#allocation2 + $0x68] sm:$0xff] (!%p1347_p6)  ;;  %v1102_v19 = vld [vmem:[#allocation2 + $0x70] sm:$0xff] (!%p1347_p6) }
 0x329   : > { %1116 = vst [vmem:[#allocation6 + $0x60] sm:$0xff] (!%p1347_p6), %v1100_v6  ;;  %1117 = vst [vmem:[#allocation6 + $0x68] sm:$0xff] (!%p1347_p6), %v1101_v7  ;;  %v1103_v20 = vld [vmem:[#allocation2 + $0x78] sm:$0xff] (!%p1347_p6) }
 0x32a   : > { %1118 = vst [vmem:[#allocation6 + $0x70] sm:$0xff] %v1102_v19  ;;  %1119 = vst [vmem:[#allocation6 + $0x78] sm:$0xff] %v1103_v20 }
 0x32b PF: > { %p2202_p8 = scmp.eq.s32.totalorder %s1235_s21, 1  ;;  %s1764_s23 = smov [#allocation6]  }
 0x32c   : > { %s1129_s24 = sshll.u32 %s1764_s23, 4  ;;  %s1130_s24 = int_to_ptr.vmem [resolvable:$true] %s1129_s24 }
 0x32d   : > { %s1674_s25 = scalar_lea.vmem %s1130_s24, 2048  ;;  %p1681_p1 = scmp.lt.s32.totalorder %s1130_s24, %s1130_s24 }
 0x32e   : > { %p1675_p10 = scmp.ne.s32.totalorder %s1130_s24, %s1674_s25  ;;  %p1682_p2 = scmp.lt.s32.totalorder %s1674_s25, %s1674_s25 }
 0x330   : > { %p1676_p12 = pnand %p1675_p10, %p2202_p8  ;;  %p1683_p11 = por %p1682_p2, %p1681_p1 }
 0x332   : > { %p1677_p0 = pneg %p1676_p12 }
 0x334   : > { %p1684_p13 = pnand %p1683_p11, %p1677_p0 }
 0x336   : > { %1687 = shalt.err (!%p1684_p13)
}
 0x337   : > { %s1688_s21 = scalar_lea.hbm %s2250_s4, 2048 }
 0x338   : > { %p1689_p3 = scmp.ne.s32.totalorder %s2250_s4, %s1688_s21  ;;  %p1694_p5 = scmp.lt.u32.totalorder %s1688_s21, %s2250_s4 }
 0x33a   : > { %p1690_p4 = pnand %p1689_p3, %p2202_p8 }
 0x33c   : > { %p1691_p9 = pneg %p1690_p4 }
 0x33e   : > { %p1696_p7 = pnand %p1694_p5, %p1691_p9 }
 0x340   : > { %1699 = shalt.err (!%p1696_p7)
}
 0x341   : > { %s1765_s12 = smov 128   ;;  %s1766_s13 = smov 8  }
 0x342   : > { %1572 = dma.vmem_to_hbm [thread:$0]  (%p2202_p8), %s1130_s24, 2048, %s2250_s4, [#allocation5], %s1765_s12, %s1765_s12, %s1766_s13  }
 0x343   : > { %1729 = dma.done.wait (%p2202_p8), [#allocation5], 2048  }
 0x344   : > { %1731 = vsyncadd (%p2202_p8), [#allocation5], 4294965248 }
 0x345 PF: > { %s18_s20 = sadd.s32 1, %s1754_s20   ;;  %s2255_s15 = smov %s1738_s16 }
 0x346   : > { %p15_p6 = scmp.ge.s32.totalorder %s18_s20, 4   ;;  %s2256_s16 = smov %s1742_s17 }
 0x347   : > { %s2257_s17 = smov %s1843_s27  ;;  %s2258_s18 = smov %s1750_s19 }
 0x348   : > { %s2259_s19 = smov %s2261_s22  ;;  %17 = sbr.rel (!%p15_p6) target bundleno = 5 (0x5), region = 95 }
 0x34f   :  { %1145 = vsyncpa [#allocation4], 1 }
 0x350   :  { %1147 = vsyncpa [#allocation4 + $0x1], 1 }
 0x351   :  { %1148 = vsyncpa [#allocation5], 1 }
 0x352   :  { %1150 = vsyncpa [#allocation5 + $0x1], 1 }

</bundles_post_ra>
